<compile_context>
chip_gen: v7x
topology: tpu7x:2x2x1
jax: 0.10.0
libtpu: 0.0.40
codegen_flags: <defaults>
</compile_context>

<pallas_src>
import jax
import jax.numpy as jnp
from jax.experimental import pallas as pl
from jax.experimental.pallas import tpu as pltpu


# ----------------------------------------------------------------------------
# Fused kernel: pos-emb + 3 linears + 2 PReLU for one batch tile.
# ----------------------------------------------------------------------------
def _mlp_pos_emb_kernel(x_ref, alpha_ref, w1a_ref, w1p_ref, b1_ref,
                        w2_ref, b2_ref, w3_ref, b3_ref, o_ref):
    x = x_ref[...]                                   # [TB, D_in]  f32
    din = x.shape[-1]

    feat = x[:, :din - 1]                            # [TB, D_in-1]
    phase = x[:, din - 1:din]                        # [TB, 1]

    pose_dim = w1p_ref.shape[0]                      # static: sin|cos width
    half = pose_dim // 2

    # Baked-in SinusoidalPosEmb table (cos folded into sin via +pi/2 shift):
    #   freq[k]     = 1 / 0.001 ** (2*(k//2)/half)   for k in [0, half)
    #   freq8       = [freq | freq], off8 = [0...0 | pi/2...pi/2]
    #   emb         = sin(phase*freq8 + off8) == [sin(ang) | cos(ang)]
    k = jax.lax.broadcasted_iota(jnp.int32, (1, pose_dim), 1)
    kk = jnp.where(k < half, k, k - half)                       # k mod half
    expo = (kk >> 1).astype(jnp.float32) * jnp.float32(2.0 / half)
    freq8 = jnp.exp(expo * jnp.float32(6.907755278982137))      # = 0.001**(-expo)
    off8 = jnp.where(k < half, jnp.float32(0.0),
                     jnp.float32(1.5707963267948966))
    emb = jnp.sin(phase * freq8 + off8)              # [TB, pose_dim] (EUP)

    # Layer 1: concat(feat, sin, cos) @ W1 + b1  ==  feat@W1a + emb@W1p + b1
    h = (jnp.dot(feat, w1a_ref[...], preferred_element_type=jnp.float32)
         + jnp.dot(emb, w1p_ref[...], preferred_element_type=jnp.float32)
         + b1_ref[...])
    a1 = alpha_ref[0]                                # PReLU slope (SMEM scalar)
    h = jnp.where(h > 0, h, a1 * h)

    # Hidden block: Dropout(p=0.0) is identity; Linear + PReLU
    h = jnp.dot(h, w2_ref[...], preferred_element_type=jnp.float32) + b2_ref[...]
    a2 = alpha_ref[1]
    h = jnp.where(h > 0, h, a2 * h)

    # Output Linear
    o_ref[...] = (jnp.dot(h, w3_ref[...], preferred_element_type=jnp.float32)
                  + b3_ref[...]).astype(o_ref.dtype)


# ----------------------------------------------------------------------------
# Wrapper: batch-tiled pallas_call, weights VMEM-resident across tiles.
# ----------------------------------------------------------------------------
def _round_up(v, m):
    return ((v + m - 1) // m) * m


@jax.jit
def mlp_pos_emb_forward(x, kp):
    """x: [B, input_dim] float32; kp: output of prepare_kernel_params."""
    B, din = x.shape
    feat_dim = kp["w1a"].shape[0]
    pose_dim = kp["w1p"].shape[0]
    L = kp["w2"].shape[0]
    out_dim = kp["w3"].shape[1]

    # Batch tile: big tiles amortize the ~0.35 us/step overhead; for B > 8 make
    # the grid have >= 2 steps so both v7x TensorCores get work ("parallel"
    # semantics); cap at 4096 rows -> padded f32 x/out double buffers ~8 MiB,
    # comfortably inside the explicitly-declared 32 MiB scoped VMEM on
    # v5e/v6e/v7x.
    if B <= 8:
        TB = B
    else:
        TB = min(_round_up(pl.cdiv(B, 2), 8), 4096)
    grid = (pl.cdiv(B, TB),)

    const = lambda i: (0, 0)   # weights / biases: resident, no re-DMA per step

    return pl.pallas_call(
        _mlp_pos_emb_kernel,
        out_shape=jax.ShapeDtypeStruct((B, out_dim), jnp.float32),
        grid=grid,
        in_specs=[
            pl.BlockSpec((TB, din), lambda i: (i, 0)),           # x tile
            pl.BlockSpec(memory_space=pltpu.MemorySpace.SMEM),   # PReLU slopes (2,)
            pl.BlockSpec((feat_dim, L), const),                  # W1 (feature rows)
            pl.BlockSpec((pose_dim, L), const),                  # W1 (sin|cos rows)
            pl.BlockSpec((1, L), const),                         # b1
            pl.BlockSpec((L, L), const),                         # W2
            pl.BlockSpec((1, L), const),                         # b2
            pl.BlockSpec((L, out_dim), const),                   # W3
            pl.BlockSpec((1, out_dim), const),                   # b3
        ],
        out_specs=pl.BlockSpec((TB, out_dim), lambda i: (i, 0)),
        compiler_params=pltpu.CompilerParams(
            dimension_semantics=("parallel",),
            vmem_limit_bytes=32 * 1024 * 1024),
    )(x, kp["alpha"], kp["w1a"], kp["w1p"], kp["b1"],
      kp["w2"], kp["b2"], kp["w3"], kp["b3"])


# ----------------------------------------------------------------------------
# Parameter init (f32, PyTorch-equivalent layout, pre-transposed to [in, out])
# ----------------------------------------------------------------------------
def init_params(key, input_dim, output_dim, latent_dim=32):
    pose_dim = latent_dim // 4
    mlp_in = input_dim + pose_dim - 1
    k1, k2, k3, k4, k5, k6 = jax.random.split(key, 6)
    scale = 0.1
    return {
        "w1": scale * jax.random.normal(k1, (mlp_in, latent_dim), jnp.float32),
        "b1": scale * jax.random.normal(k2, (1, latent_dim), jnp.float32),
        "a1": jnp.float32(0.25),                       # PReLU default init
        "w2": scale * jax.random.normal(k3, (latent_dim, latent_dim), jnp.float32),
        "b2": scale * jax.random.normal(k4, (1, latent_dim), jnp.float32),
        "a2": jnp.float32(0.25),
        "w3": scale * jax.random.normal(k5, (latent_dim, output_dim), jnp.float32),
        "b3": scale * jax.random.normal(k6, (1, output_dim), jnp.float32),
    }


def prepare_kernel_params(params, input_dim, latent_dim=32):
    """One-time transform: split W1 into feature rows vs. pos-emb (sin|cos)
    rows and pack the two PReLU slopes into one SMEM array."""
    feat_dim = input_dim - 1
    w1 = params["w1"]
    return {
        "w1a": w1[:feat_dim].astype(jnp.float32),     # feature rows
        "w1p": w1[feat_dim:].astype(jnp.float32),     # [sin | cos] rows
        "b1": params["b1"].astype(jnp.float32),
        "w2": params["w2"].astype(jnp.float32),
        "b2": params["b2"].astype(jnp.float32),
        "w3": params["w3"].astype(jnp.float32),
        "b3": params["b3"].astype(jnp.float32),
        "alpha": jnp.stack([params["a1"], params["a2"]]).astype(jnp.float32),
    }


# ----------------------------------------------------------------------------
# Pure-JAX f32 reference (mirrors the PyTorch forward) for a sanity check
# ----------------------------------------------------------------------------
def reference_forward(x, params, latent_dim=32):
    pose_dim = latent_dim // 4
    half = pose_dim // 2
    phase = x[:, -1]
    k = jnp.arange(half)
    freq = 1.0 / (0.001 ** (2 * (k // 2) / half))
    ang = phase[:, None] * freq[None, :]
    pos_emb = jnp.concatenate([jnp.sin(ang), jnp.cos(ang)], axis=-1)
    h = jnp.concatenate([x[:, :-1], pos_emb], axis=1)

    def prelu(v, a):
        return jnp.where(v > 0, v, a * v)

    h = prelu(h @ params["w1"] + params["b1"], params["a1"])
    h = prelu(h @ params["w2"] + params["b2"], params["a2"])
    return h @ params["w3"] + params["b3"]


if __name__ == "__main__":
    B = 8
    input_dim = 9          # last column is the "phase"
    output_dim = 16
    latent_dim = 32        # pose_embedding_dim = 8, mlp input = 9 + 8 - 1 = 16

    key = jax.random.PRNGKey(0)
    kx, kpkey = jax.random.split(key)
    x = jax.random.normal(kx, (B, input_dim), jnp.float32)

    params = init_params(kpkey, input_dim, output_dim, latent_dim)
    kparams = prepare_kernel_params(params, input_dim, latent_dim)

    out = jax.block_until_ready(mlp_pos_emb_forward(x, kparams))

    ref = reference_forward(x, params, latent_dim)
    assert out.shape == (B, output_dim)
    max_err = float(jnp.max(jnp.abs(out - ref)))
    # f32 MXU path; tolerance covers MXU pass precision + sin(x+pi/2) vs cos(x).
    assert jnp.allclose(out, ref, atol=1e-2, rtol=1e-2), \
        f"mismatch vs reference (max abs err {max_err})"

    print("KERNEL_OK")
</pallas_src>

<mosaic_0001>
module attributes {stable_mosaic.version = 11 : i64} {
  func.func @_mlp_pos_emb_kernel(%arg0: i32, %arg1: memref<8x9xf32, #tpu.memory_space<vmem>>, %arg2: memref<2xf32, #tpu.memory_space<smem>>, %arg3: memref<8x32xf32, #tpu.memory_space<vmem>>, %arg4: memref<8x32xf32, #tpu.memory_space<vmem>>, %arg5: memref<1x32xf32, #tpu.memory_space<vmem>>, %arg6: memref<32x32xf32, #tpu.memory_space<vmem>>, %arg7: memref<1x32xf32, #tpu.memory_space<vmem>>, %arg8: memref<32x16xf32, #tpu.memory_space<vmem>>, %arg9: memref<1x16xf32, #tpu.memory_space<vmem>>, %arg10: memref<8x16xf32, #tpu.memory_space<vmem>>) attributes {dimension_semantics = [#tpu.dimension_semantics<parallel>], iteration_bounds = array<i64: 1>, scalar_prefetch = 0 : i64, scratch_operands = 0 : i64, tpu.core_type = #tpu.core_type<tc>, window_params = [{transform_indices = @transform_0, window_bounds = array<i64: 8, 9>}, {transform_indices = @transform_1, window_bounds = array<i64: 2>}, {pipeline_mode = #tpu.pipeline_mode<synchronous>, transform_indices = @transform_2, window_bounds = array<i64: 8, 32>}, {pipeline_mode = #tpu.pipeline_mode<synchronous>, transform_indices = @transform_3, window_bounds = array<i64: 8, 32>}, {pipeline_mode = #tpu.pipeline_mode<synchronous>, transform_indices = @transform_4, window_bounds = array<i64: 1, 32>}, {pipeline_mode = #tpu.pipeline_mode<synchronous>, transform_indices = @transform_5, window_bounds = array<i64: 32, 32>}, {pipeline_mode = #tpu.pipeline_mode<synchronous>, transform_indices = @transform_6, window_bounds = array<i64: 1, 32>}, {pipeline_mode = #tpu.pipeline_mode<synchronous>, transform_indices = @transform_7, window_bounds = array<i64: 32, 16>}, {pipeline_mode = #tpu.pipeline_mode<synchronous>, transform_indices = @transform_8, window_bounds = array<i64: 1, 16>}, {transform_indices = @transform_9, window_bounds = array<i64: 8, 16>}]} {
    %c0 = arith.constant 0 : index
    %c0_0 = arith.constant 0 : index
    %0 = vector.load %arg1[%c0, %c0_0] : memref<8x9xf32, #tpu.memory_space<vmem>>, vector<8x9xf32>
    %1 = vector.extract_strided_slice %0 {offsets = [0, 0], sizes = [8, 8], strides = [1, 1]} : vector<8x9xf32> to vector<8x8xf32>
    %2 = vector.extract_strided_slice %0 {offsets = [0, 8], sizes = [8, 1], strides = [1, 1]} : vector<8x9xf32> to vector<8x1xf32>
    %3 = tpu.iota {dimensions = array<i32: 1>} : vector<1x8xi32>
    %c4_i32 = arith.constant 4 : i32
    %4 = vector.broadcast %c4_i32 : i32 to vector<1x8xi32>
    %5 = arith.cmpi slt, %3, %4 : vector<1x8xi32>
    %c4_i32_1 = arith.constant 4 : i32
    %6 = vector.broadcast %c4_i32_1 : i32 to vector<1x8xi32>
    %7 = arith.subi %3, %6 : vector<1x8xi32>
    %8 = arith.select %5, %3, %7 : vector<1x8xi1>, vector<1x8xi32>
    %c1_i32 = arith.constant 1 : i32
    %9 = vector.broadcast %c1_i32 : i32 to vector<1x8xi32>
    %10 = arith.shrsi %8, %9 : vector<1x8xi32>
    %11 = arith.sitofp %10 : vector<1x8xi32> to vector<1x8xf32>
    %cst = arith.constant 5.000000e-01 : f32
    %12 = vector.broadcast %cst : f32 to vector<1x8xf32>
    %13 = arith.mulf %11, %12 : vector<1x8xf32>
    %cst_2 = arith.constant 6.90775537 : f32
    %14 = vector.broadcast %cst_2 : f32 to vector<1x8xf32>
    %15 = arith.mulf %13, %14 : vector<1x8xf32>
    %16 = math.exp %15 : vector<1x8xf32>
    %c4_i32_3 = arith.constant 4 : i32
    %17 = vector.broadcast %c4_i32_3 : i32 to vector<1x8xi32>
    %18 = arith.cmpi slt, %3, %17 : vector<1x8xi32>
    %cst_4 = arith.constant 0.000000e+00 : f32
    %cst_5 = arith.constant 1.57079637 : f32
    %19 = vector.broadcast %cst_4 : f32 to vector<1x8xf32>
    %20 = vector.broadcast %cst_5 : f32 to vector<1x8xf32>
    %21 = arith.select %18, %19, %20 : vector<1x8xi1>, vector<1x8xf32>
    %22 = vector.broadcast %2 : vector<8x1xf32> to vector<8x8xf32>
    %23 = vector.broadcast %16 : vector<1x8xf32> to vector<8x8xf32>
    %24 = arith.mulf %22, %23 : vector<8x8xf32>
    %25 = vector.broadcast %21 : vector<1x8xf32> to vector<8x8xf32>
    %26 = arith.addf %24, %25 : vector<8x8xf32>
    %27 = math.sin %26 : vector<8x8xf32>
    %c0_6 = arith.constant 0 : index
    %c0_7 = arith.constant 0 : index
    %28 = vector.load %arg3[%c0_6, %c0_7] : memref<8x32xf32, #tpu.memory_space<vmem>>, vector<8x32xf32>
    %cst_8 = arith.constant dense<0.000000e+00> : vector<8x32xf32>
    %29 = tpu.matmul %1, %28, %cst_8 {dimension_numbers = #tpu.dot_dimension_numbers<[1], [0], [0], [1], [0, 0, 1, 1], [], []>} : vector<8x8xf32>, vector<8x32xf32>, vector<8x32xf32> -> vector<8x32xf32>
    %c0_9 = arith.constant 0 : index
    %c0_10 = arith.constant 0 : index
    %30 = vector.load %arg4[%c0_9, %c0_10] : memref<8x32xf32, #tpu.memory_space<vmem>>, vector<8x32xf32>
    %cst_11 = arith.constant dense<0.000000e+00> : vector<8x32xf32>
    %31 = tpu.matmul %27, %30, %cst_11 {dimension_numbers = #tpu.dot_dimension_numbers<[1], [0], [0], [1], [0, 0, 1, 1], [], []>} : vector<8x8xf32>, vector<8x32xf32>, vector<8x32xf32> -> vector<8x32xf32>
    %32 = arith.addf %29, %31 : vector<8x32xf32>
    %c0_12 = arith.constant 0 : index
    %c0_13 = arith.constant 0 : index
    %33 = vector.load %arg5[%c0_12, %c0_13] : memref<1x32xf32, #tpu.memory_space<vmem>>, vector<1x32xf32>
    %34 = vector.broadcast %33 : vector<1x32xf32> to vector<8x32xf32>
    %35 = arith.addf %32, %34 : vector<8x32xf32>
    %c0_14 = arith.constant 0 : index
    %36 = memref.load %arg2[%c0_14] : memref<2xf32, #tpu.memory_space<smem>>
    %cst_15 = arith.constant 0.000000e+00 : f32
    %37 = vector.broadcast %cst_15 : f32 to vector<8x32xf32>
    %38 = arith.cmpf ogt, %35, %37 : vector<8x32xf32>
    %39 = vector.broadcast %36 : f32 to vector<8x32xf32>
    %40 = arith.mulf %39, %35 : vector<8x32xf32>
    %41 = arith.select %38, %35, %40 : vector<8x32xi1>, vector<8x32xf32>
    %c0_16 = arith.constant 0 : index
    %c0_17 = arith.constant 0 : index
    %42 = vector.load %arg6[%c0_16, %c0_17] : memref<32x32xf32, #tpu.memory_space<vmem>>, vector<32x32xf32>
    %cst_18 = arith.constant dense<0.000000e+00> : vector<8x32xf32>
    %43 = tpu.matmul %41, %42, %cst_18 {dimension_numbers = #tpu.dot_dimension_numbers<[1], [0], [0], [1], [0, 0, 1, 1], [], []>} : vector<8x32xf32>, vector<32x32xf32>, vector<8x32xf32> -> vector<8x32xf32>
    %c0_19 = arith.constant 0 : index
    %c0_20 = arith.constant 0 : index
    %44 = vector.load %arg7[%c0_19, %c0_20] : memref<1x32xf32, #tpu.memory_space<vmem>>, vector<1x32xf32>
    %45 = vector.broadcast %44 : vector<1x32xf32> to vector<8x32xf32>
    %46 = arith.addf %43, %45 : vector<8x32xf32>
    %c1 = arith.constant 1 : index
    %47 = memref.load %arg2[%c1] : memref<2xf32, #tpu.memory_space<smem>>
    %cst_21 = arith.constant 0.000000e+00 : f32
    %48 = vector.broadcast %cst_21 : f32 to vector<8x32xf32>
    %49 = arith.cmpf ogt, %46, %48 : vector<8x32xf32>
    %50 = vector.broadcast %47 : f32 to vector<8x32xf32>
    %51 = arith.mulf %50, %46 : vector<8x32xf32>
    %52 = arith.select %49, %46, %51 : vector<8x32xi1>, vector<8x32xf32>
    %c0_22 = arith.constant 0 : index
    %c0_23 = arith.constant 0 : index
    %53 = vector.load %arg8[%c0_22, %c0_23] : memref<32x16xf32, #tpu.memory_space<vmem>>, vector<32x16xf32>
    %cst_24 = arith.constant dense<0.000000e+00> : vector<8x16xf32>
    %54 = tpu.matmul %52, %53, %cst_24 {dimension_numbers = #tpu.dot_dimension_numbers<[1], [0], [0], [1], [0, 0, 1, 1], [], []>} : vector<8x32xf32>, vector<32x16xf32>, vector<8x16xf32> -> vector<8x16xf32>
    %c0_25 = arith.constant 0 : index
    %c0_26 = arith.constant 0 : index
    %55 = vector.load %arg9[%c0_25, %c0_26] : memref<1x16xf32, #tpu.memory_space<vmem>>, vector<1x16xf32>
    %56 = vector.broadcast %55 : vector<1x16xf32> to vector<8x16xf32>
    %57 = arith.addf %54, %56 : vector<8x16xf32>
    %c0_27 = arith.constant 0 : index
    %c0_28 = arith.constant 0 : index
    %58 = vector.load %arg10[%c0_27, %c0_28] : memref<8x16xf32, #tpu.memory_space<vmem>>, vector<8x16xf32>
    tpu.vector_store %arg10[%c0_27, %c0_28], %57 {strides = array<i32>} : memref<8x16xf32, #tpu.memory_space<vmem>>, vector<8x16xf32>,
    return
  }
  func.func @transform_0(%arg0: i32) -> (i32, i32) {
    %c0_i32 = arith.constant 0 : i32
    %c0_i32_0 = arith.constant 0 : i32
    return %arg0, %c0_i32 : i32, i32
  }
  func.func @transform_1(%arg0: i32) -> i32 {
    %c0_i32 = arith.constant 0 : i32
    %c0_i32_0 = arith.constant 0 : i32
    return %c0_i32 : i32
  }
  func.func @transform_2(%arg0: i32) -> (i32, i32) {
    %c0_i32 = arith.constant 0 : i32
    %c0_i32_0 = arith.constant 0 : i32
    %c0_i32_1 = arith.constant 0 : i32
    return %c0_i32, %c0_i32_0 : i32, i32
  }
  func.func @transform_3(%arg0: i32) -> (i32, i32) {
    %c0_i32 = arith.constant 0 : i32
    %c0_i32_0 = arith.constant 0 : i32
    %c0_i32_1 = arith.constant 0 : i32
    return %c0_i32, %c0_i32_0 : i32, i32
  }
  func.func @transform_4(%arg0: i32) -> (i32, i32) {
    %c0_i32 = arith.constant 0 : i32
    %c0_i32_0 = arith.constant 0 : i32
    %c0_i32_1 = arith.constant 0 : i32
    return %c0_i32, %c0_i32_0 : i32, i32
  }
  func.func @transform_5(%arg0: i32) -> (i32, i32) {
    %c0_i32 = arith.constant 0 : i32
    %c0_i32_0 = arith.constant 0 : i32
    %c0_i32_1 = arith.constant 0 : i32
    return %c0_i32, %c0_i32_0 : i32, i32
  }
  func.func @transform_6(%arg0: i32) -> (i32, i32) {
    %c0_i32 = arith.constant 0 : i32
    %c0_i32_0 = arith.constant 0 : i32
    %c0_i32_1 = arith.constant 0 : i32
    return %c0_i32, %c0_i32_0 : i32, i32
  }
  func.func @transform_7(%arg0: i32) -> (i32, i32) {
    %c0_i32 = arith.constant 0 : i32
    %c0_i32_0 = arith.constant 0 : i32
    %c0_i32_1 = arith.constant 0 : i32
    return %c0_i32, %c0_i32_0 : i32, i32
  }
  func.func @transform_8(%arg0: i32) -> (i32, i32) {
    %c0_i32 = arith.constant 0 : i32
    %c0_i32_0 = arith.constant 0 : i32
    %c0_i32_1 = arith.constant 0 : i32
    return %c0_i32, %c0_i32_0 : i32, i32
  }
  func.func @transform_9(%arg0: i32) -> (i32, i32) {
    %c0_i32 = arith.constant 0 : i32
    %c0_i32_0 = arith.constant 0 : i32
    return %arg0, %c0_i32 : i32, i32
  }
}

</mosaic_0001>

<bundles_post_ra>
// kernel: mlp_pos_emb_forward.1
= control target key start
LH: loop header
LB: loop body
LE: loop exit
PB: predicated region body
PF: predicated region fallthrough
CT: control target
= control target key end

     0   :  { %14 = vsyncpa [#allocation4], 0  ;;  %s810_s0 = inlined_call_operand.vmem [shape: f32[8,9], index: 0, kind: input, shape index: {}]   ;;  %s811_s1 = inlined_call_operand.vmem [shape: f32[2], index: 1, kind: input, shape index: {}]   ;;  %s812_s2 = inlined_call_operand.vmem [shape: f32[8,32], index: 2, kind: input, shape index: {}]   ;;  %s813_s3 = inlined_call_operand.vmem [shape: f32[8,32], index: 3, kind: input, shape index: {}]   ;;  %s814_s4 = inlined_call_operand.vmem [shape: f32[1,32], index: 4, kind: input, shape index: {}]   ;;  %s815_s5 = inlined_call_operand.vmem [shape: f32[32,32], index: 5, kind: input, shape index: {}]   ;;  %s816_s6 = inlined_call_operand.vmem [shape: f32[1,32], index: 6, kind: input, shape index: {}]   ;;  %s817_s7 = inlined_call_operand.vmem [shape: f32[32,16], index: 7, kind: input, shape index: {}]   ;;  %s818_s8 = inlined_call_operand.vmem [shape: f32[1,16], index: 8, kind: input, shape index: {}]   ;;  %s819_s9 = inlined_call_operand.hbm [shape: f32[8,16], index: 9, kind: output, shape index: {}]  }
   0x1   :  { %15 = vsyncpa [#allocation3], 0  ;;  %s24_s11 = sshll.u32 %s811_s1, 4  ;;  %s25_s11 = int_to_ptr.vmem [resolvable:$true] %s24_s11 }
   0x2   :  { %s617_s12 = scalar_lea.vmem %s25_s11, 16  ;;  %p622_p1 = scmp.lt.s32.totalorder %s25_s11, %s25_s11 }
   0x3   :  { %p618_p0 = scmp.ne.s32.totalorder %s25_s11, %s617_s12  ;;  %p623_p2 = scmp.lt.s32.totalorder %s617_s12, %s617_s12 }
   0x5   :  { %p624_p3 = por %p623_p2, %p622_p1 }
   0x7   :  { %p625_p4 = pnand %p624_p3, %p618_p0 }
   0x9   :  { %628 = shalt.err (!%p625_p4)
}
   0xa   :  { %s655_s13 = smov [#allocation2]  }
   0xb   :  { %27 = dma.vmem_to_smem %s25_s11, 16, %s655_s13, [#allocation4]  }
   0xc   :  { %651 = dma.done.wait [#allocation4], 16  }
   0xd   :  { %652 = vsyncadd [#allocation4], 4294967280 }
   0xe   :  { %45 = sfence }
   0xf   :  { %v46_v0 = vld [vmem:[%s810_s0] sm:$0xff]  ;;  %v656_v1 = vmov 8   ;;  %v657_v4 = vmov 0.0   ;;  %vm172_vm0 = vcmask 64512   ;;  %vm658_vm1 = vmmov 0   ;;  %s326_s28 = sld [smem:[#allocation2]] }
  0x10   :  { %610 = vset.pattern.permute.xlu0 %v656_v1  ;;  %v170_v2 = vld [vmem:[%s812_s2] sm:$0xff]  ;;  %554 = vmatprep.subr.mxu1 %v657_v4  ;;  %v47_v5 = vlaneseq  ;;  %v659_v15 = vmov 1.5707964   ;;  %v660_v31 = vmov 2102212464  }
  0x11   :  { %61 = vperm.xlu0 %610, %v46_v0   ;;  %v171_v3 = vld [vmem:[%s813_s3] sm:$0xff]  ;;  %549 = vmatprep.subr.mxu0 %v657_v4  ;;  %v661_v33 = vmov 920167782   ;;  %v662_v37 = vmov 1326507024  }
  0x12   :  { %555 = vmatpush3.msra.mxu1 %v170_v2  ;;  %556 = vmatprep.mubr.msk.f32.mxu1 %vm658_vm1, %v657_v4  ;;  %v48_v6 = vand.u32 127, %v47_v5  ;;  %v663_v39 = vmov 683565275   ;;  %v664_v41 = vmov 2475754826  }
  0x13   :  { %550 = vmatpush3.msra.mxu0 %v171_v3  ;;  %551 = vmatprep.mubr.msk.f32.mxu0 %vm658_vm1, %v657_v4  ;;  %v665_v44 = vmov 2131351028  }
  0x14   :  { %557 = vmatmul.mubr.msk.f32.vlgmr.msra.gmra.mrb[0].mxu1 %vm172_vm0, %v46_v0  ;;  %v522_v7 = vadd.s32 4294967292, %v48_v6  ;;  %vm49_vm2 = vcmp.lt.s32.totalorder %v48_v6, 4 }
  0x15   :  { %578 = vmatprep.mubr.msk.f32.mxu1 %vm658_vm1, %v657_v4  ;;  %v58_v16 = vsel %vm49_vm2, 0.0, %v659_v15 }
  0x16   :  { %v51_v8 = vsel %vm49_vm2, %v48_v6, %v522_v7 }
  0x17   :  { %v52_v9 = vshra.s32 %v51_v8, 1 }
  0x19   :  { %v53_v10 = vcvt.s32.f32 %v52_v9 }
  0x1b   :  { %v54_v11 = vmul.f32 0.5, %v53_v10 }
  0x1d   :  { %v55_v12 = vmul.f32 6.9077554, %v54_v11 }
  0x1f   :  { %v56_v13 = vmul.f32 1.442695, %v55_v12 }
  0x21   :  { %611 = vpow2.f32 %v56_v13 }
  0x2b   :  { %v612_v14 = vpop.eup %611 }
  0x90   :  { %v62_v17 = vpop.permute.xlu0 %61 }
  0x91   :  { %v64_v18 = vmul.f32 %v612_v14, %v62_v17 }
  0x93   :  { %v739_v19 = vadd.f32 %v64_v18, %v58_v16 }
  0x95   :  { %v69_v20 = vand.u32 2139095040, %v739_v19  ;;  %v66_v21 = vand.u32 2147483647, %v739_v19  ;;  %vm68_vm10 = vcmp.lt.s32.totalorder %v739_v19, 0  ;;  %vm158_vm15 = vweird.f32 %v739_v19 }
  0x97   :  { %v70_v22 = vshrl.u32 %v69_v20, 23  ;;  %v73_v24 = vand.u32 8388607, %v66_v21  ;;  %vm67_vm11 = vcmp.le.f32.partialorder %v66_v21, 0.7853982 }
  0x99   :  { %v523_v23 = vadd.s32 4294967169, %v70_v22  ;;  %v74_v27 = vor.u32 8388608, %v73_v24 }
  0x9b   :  { %v76_v25 = vadd.s32 1, %v523_v23  ;;  %v114_v35 = vshll.u32 %v74_v27, 8 }
  0x9d   :  { %vm77_vm3 = vcmp.gt.s32.totalorder %v76_v25, 0 }
  0x9e   :  { %v78_v26 = vsel %vm77_vm3, %v76_v25, 0  ;;  %vm505_vm3 = vcmask 130048  }
  0x9f   :  { %v80_v28 = vand.u32 31, %v78_v26  ;;  %v79_v29 = vshrl.u32 %v78_v26, 5 }
  0xa1   :  { %v81_v30 = vsub.s32 32, %v80_v28  ;;  %v92_v32 = vshll.u32 %v660_v31, %v80_v28  ;;  %v95_v34 = vshll.u32 %v661_v33, %v80_v28  ;;  %v83_v40 = vshll.u32 %v663_v39, %v80_v28 }
  0xa2   :  { %v86_v43 = vshll.u32 %v664_v41, %v80_v28  ;;  %v89_v46 = vshll.u32 %v665_v44, %v80_v28  ;;  %vm101_vm4 = vcmp.lt.s32.totalorder %v79_v29, 4  ;;  %vm98_vm5 = vcmp.lt.s32.totalorder %v79_v29, 1 }
  0xa3   :  { %v93_v36 = vshrl.u32 %v661_v33, %v81_v30  ;;  %v96_v38 = vshrl.u32 %v662_v37, %v81_v30  ;;  %v84_v42 = vshrl.u32 %v664_v41, %v81_v30  ;;  %v87_v45 = vshrl.u32 %v665_v44, %v81_v30 }
  0xa4   :  { %v90_v47 = vshrl.u32 %v660_v31, %v81_v30  ;;  %v82_v51 = vshrl.u32 %v663_v39, %v81_v30  ;;  %vm99_vm6 = vcmp.lt.s32.totalorder %v79_v29, 2  ;;  %vm100_vm7 = vcmp.lt.s32.totalorder %v79_v29, 3 }
  0xa5   :  { %v94_v48 = vor.u32 %v93_v36, %v92_v32  ;;  %v97_v49 = vor.u32 %v96_v38, %v95_v34  ;;  %v85_v50 = vor.u32 %v84_v42, %v83_v40  ;;  %v88_v52 = vor.u32 %v87_v45, %v86_v43 }
  0xa6   :  { %v91_v53 = vor.u32 %v90_v47, %v89_v46 }
  0xa7   :  { %v107_v54 = vsel %vm101_vm4, %v94_v48, 920167782  ;;  %v111_v55 = vsel %vm101_vm4, %v97_v49, 1326507024  ;;  %v106_v57 = vsel %vm98_vm5, %v85_v50, %v88_v52  ;;  %v102_v60 = vsel %vm98_vm5, %v82_v51, %v85_v50  ;;  %v331_v51 = vld [vmem:[%s815_s5] sm:$0xff] }
  0xa8   :  { %v103_v56 = vsel %vm101_vm4, %v91_v53, 2102212464  ;;  %v108_v58 = vsel %vm100_vm7, %v91_v53, %v107_v54  ;;  %v110_v59 = vsel %vm98_vm5, %v88_v52, %v91_v53  ;;  %v112_v63 = vsel %vm100_vm7, %v94_v48, %v111_v55 }
  0xa9   :  { %v104_v61 = vsel %vm100_vm7, %v88_v52, %v103_v56  ;;  %v109_v62 = vsel %vm99_vm6, %v106_v57, %v108_v58  ;;  %v113_v0 = vsel %vm99_vm6, %v110_v59, %v112_v63  ;;  %v332_v52 = vld [vmem:[%s815_s5 + $0x8] sm:$0xff]  ;;  %v666_v54 = vmov 0.0|0.0   ;;  %v421_v56 = vld [vmem:[%s817_s7] sm:$0xff] }
  0xaa   :  { %v745_v1 = vmul.u32.u64.low %v114_v35, %v109_v62  ;;  %v746_v2 = vmul.u32.u64.high %v114_v35, %v109_v62, %v745_v1  ;;  %v748_v3 = vmul.u32.u64.low %v114_v35, %v113_v0  ;;  %v749_v5 = vmul.u32.u64.high %v114_v35, %v113_v0, %v748_v3  ;;  %581 = vmatprep.subr.bf16.mxu0 %v666_v54  ;;  %587 = vmatprep.subr.bf16.mxu1 %v666_v54  ;;  %v422_v57 = vld [vmem:[%s817_s7 + $0x8] sm:$0xff] }
  0xab   :  { %v105_v6 = vsel %vm99_vm6, %v102_v60, %v104_v61  ;;  %v582_v53 = vpack.c.bf16 %v332_v52, %v331_v51  ;;  %v588_v58 = vpack.c.bf16 %v422_v57, %v421_v56  ;;  %v529_v60 = vld [vmem:[%s814_s4] ss:$0 sm:$0xff]  ;;  %v328_v63 = vstv %s326_s28  ;;  %v423_v3 = vld [vmem:[%s817_s7 + $0x10] sm:$0xff]  ;;  %s532_s4 = sld [smem:[#allocation2 + $0x1]] }
  0xac   :  { %v124_v7 = vadd.s32 1, %v746_v2  ;;  %v121_v8 = vmul.u32 %v114_v35, %v105_v6  ;;  %vm123_vm8 = vc.u32 %v749_v5, %v745_v1  ;;  %v122_v22 = vadd.s32 %v745_v1, %v749_v5  ;;  %v424_v5 = vld [vmem:[%s817_s7 + $0x18] sm:$0xff]  ;;  %s667_s7 = smov [#allocation5]  }
  0xad   :  { %589 = vmatpush3.bf16.msra.mxu1 %v588_v58  ;;  %v591_v6 = vpack.c.bf16 %v424_v5, %v423_v3  ;;  %s513_s16 = sshll.u32 %s667_s7, 4  ;;  %s514_s16 = int_to_ptr.vmem [resolvable:$true] %s513_s16 }
  0xae   :  { %v125_v9 = vsel %vm123_vm8, %v124_v7, %v746_v2  ;;  %590 = vmatprep.subr.bf16.mxu1 %v666_v54  ;;  %v530_v7 = vld [vmem:[%s816_s6] ss:$0 sm:$0xff]  ;;  %s629_s6 = scalar_lea.vmem %s514_s16, 128  ;;  %p634_p6 = scmp.lt.s32.totalorder %s514_s16, %s514_s16 }
  0xaf   :  { %v126_v10 = vadd.s32 %v125_v9, %v121_v8  ;;  %p630_p5 = scmp.ne.s32.totalorder %s514_s16, %s629_s6  ;;  %p635_p7 = scmp.lt.s32.totalorder %s629_s6, %s629_s6 }
  0xb1   :  { %v127_v11 = vadd.s32 536870912, %v126_v10  ;;  %592 = vmatpush3.bf16.msra.mxu1 %v591_v6  ;;  %v418_v9 = vstv %s532_s4  ;;  %p636_p8 = por %p635_p7, %p634_p6 }
  0xb3   :  { %v128_v12 = vshrl.u32 %v127_v11, 30  ;;  %p637_p9 = pnand %p636_p8, %p630_p5 }
  0xb5   :  { %v129_v13 = vshll.u32 %v128_v12, 30  ;;  %v152_v34 = vsub.s32 4, %v128_v12 }
  0xb7   :  { %v130_v14 = vsub.s32 %v126_v10, %v129_v13  ;;  %v153_v37 = vsel %vm68_vm10, %v152_v34, %v128_v12 }
  0xb8   :  { %v155_v39 = vsel %vm67_vm11, 0, %v153_v37 }
  0xb9   :  { %v132_v15 = vsub.s32 0, %v130_v14  ;;  %v159_v40 = vadd.s32 3, %v155_v39 }
  0xbb   :  { %v524_v16 = vmin.u32 %v132_v15, %v130_v14  ;;  %v160_v41 = vand.u32 3, %v159_v40 }
  0xbd   :  { %v134_v17 = vclz %v524_v16  ;;  %vm165_vm12 = vcmp.eq.s32.totalorder %v160_v41, 2  ;;  %vm162_vm13 = vcmp.eq.s32.totalorder %v160_v41, 0  ;;  %vm161_vm14 = vcmp.lt.s32.totalorder %v160_v41, 2 }
  0xbf   :  { %v525_v18 = vadd.s32 4294967294, %v134_v17 }
  0xc1   :  { %vm526_vm9 = vcmp.lt.s32.totalorder %v525_v18, 0 }
  0xc2   :  { %v137_v20 = vsel %vm526_vm9, 0, %v525_v18 }
  0xc3   :  { %v138_v23 = vsub.s32 32, %v137_v20  ;;  %v142_v24 = vsub.s32 4294967266, %v137_v20  ;;  %v139_v25 = vshll.u32 %v130_v14, %v137_v20  ;;  %v533_v14 = vld [vmem:[%s818_s8] ss:$0 sm:$0xff] }
  0xc5   :  { %v140_v26 = vshrl.u32 %v122_v22, %v138_v23  ;;  %v143_v27 = vadd.s32 127, %v142_v24 }
  0xc7   :  { %v141_v28 = vor.u32 %v140_v26, %v139_v25  ;;  %v144_v29 = vshll.u32 %v143_v27, 23 }
  0xc9   :  { %v145_v30 = vor.u32 4788187, %v144_v29  ;;  %v148_v32 = vcvt.s32.f32 %v141_v28 }
  0xcb   :  { %v146_v31 = vand.u32 2147483647, %v145_v30 }
  0xcd   :  { %v149_v33 = vmul.f32 %v148_v32, %v146_v31 }
  0xcf   :  { %v150_v35 = vxor.u32 2147483648, %v149_v33 }
  0xd1   :  { %v151_v36 = vsel %vm68_vm10, %v150_v35, %v149_v33 }
  0xd2   :  { %v154_v38 = vsel %vm67_vm11, %v739_v19, %v151_v36  ;;  %v334_v19 = vld [vmem:[%s815_s5 + $0x18] sm:$0xff] }
  0xd3   :  { %613 = vcosq.f32 %v154_v38 }
  0xd4   :  { %615 = vsinq.f32 %v154_v38 }
  0xdd   :  { %v614_v42 = vpop.eup %613 }
  0xde   :  { %v616_v43 = vpop.eup %615  ;;  %v166_v44 = vxor.u32 2147483648, %v614_v42 }
  0xdf   :  { %v163_v45 = vxor.u32 2147483648, %v616_v43 }
  0xe0   :  { %v167_v46 = vsel %vm165_vm12, %v166_v44, %v616_v43 }
  0xe1   :  { %v164_v47 = vsel %vm162_vm13, %v614_v42, %v163_v45 }
  0xe2   :  { %v168_v21 = vsel %vm161_vm14, %v164_v47, %v167_v46 }
  0xe3   :  { %v169_v48 = vsel %vm158_vm15, nan, %v168_v21 }
  0xe4   :  { %552 = vmatmul.mubr.msk.f32.vlgmr.msra.gmra.mrb[0].mxu0 %vm172_vm0, %v169_v48 }
  0xe5   :  { %567 = vmatprep.mubr.msk.f32.mxu0 %vm658_vm1, %v657_v4  ;;  %583 = vmatpush3.bf16.msra.mxu0 %v582_v53  ;;  %v333_v4 = vld [vmem:[%s815_s5 + $0x10] sm:$0xff]  ;;  %vm342_vm1 = vcmask 261120  }
  0xe6   :  { %584 = vmatprep.subr.bf16.mxu0 %v666_v54  ;;  %v585_v55 = vpack.c.bf16 %v334_v19, %v333_v4 }
  0xe7   :  { %v314_v49 = vpop.f32.mrb[0].mxu1 }
  0xe8   :  { %v558_v50 = vpop.f32.mrb[1].mxu1 }
  0xe9   :  { %586 = vmatpush3.bf16.msra.mxu0 %v585_v55 }
 0x1b7   :  { %v242_v59 = vpop.f32.mrb[0].mxu0 }
 0x1b8   :  { %v315_v61 = vadd.f32 %v314_v49, %v242_v59  ;;  %v553_v62 = vpop.f32.mrb[1].mxu0 }
 0x1ba   :  { %v325_v0 = vadd.f32 %v529_v60, %v315_v61 }
 0x1bc   :  { %vm327_vm0 = vcmp.gt.f32.partialorder %v325_v0, 0.0  ;;  %v329_v1 = vmul.f32 %v328_v63, %v325_v0 }
 0x1be   :  { %v330_v2 = vsel %vm327_vm0, %v325_v0, %v329_v1 }
 0x1bf   :  { %568 = vmatmul.mubr.msk.f32.vlgmr.msra.gmra.mrb[2].mxu0 %vm342_vm1, %v330_v2 }
 0x292   :  { %v412_v8 = vpop.f32.mrb[2].mxu0 }
 0x293   :  { %v413_v10 = vadd.f32 %v530_v7, %v412_v8  ;;  %v569_v11 = vpop.f32.mrb[3].mxu0 }
 0x295   :  { %vm417_vm2 = vcmp.gt.f32.partialorder %v413_v10, 0.0  ;;  %v419_v12 = vmul.f32 %v418_v9, %v413_v10 }
 0x297   :  { %v420_v13 = vsel %vm417_vm2, %v413_v10, %v419_v12 }
 0x298   :  { %579 = vmatmul.mubr.msk.f32.vlgmr.msra.gmra.mrb[2].mxu1 %vm342_vm1, %v420_v13 }
 0x36b   :  { %v501_v15 = vpop.f32.mrb[2].mxu1 }
 0x36c   :  { %v502_v16 = vadd.f32 %v533_v14, %v501_v15  ;;  %v580_v17 = vpop.f32.mrb[3].mxu1 }
 0x36e   :  { %506 = vst.msk [vmem:[#allocation5] sm:$0xff] %vm505_vm3, %v502_v16 }
 0x36f   :  { %640 = shalt.err (!%p637_p9)
}
 0x370   :  { %s641_s0 = scalar_lea.hbm %s819_s9, 128 }
 0x371   :  { %p642_p10 = scmp.ne.s32.totalorder %s819_s9, %s641_s0  ;;  %p645_p11 = scmp.lt.u32.totalorder %s641_s0, %s819_s9 }
 0x373   :  { %p647_p12 = pnand %p645_p11, %p642_p10 }
 0x375   :  { %650 = shalt.err (!%p647_p12)
}
 0x376   :  { %516 = dma.vmem_to_hbm [thread:$0]  %s514_s16, 128, %s819_s9, [#allocation3]  }
 0x377   :  { %653 = dma.done.wait [#allocation3], 128  }
 0x378   :  { %654 = vsyncadd [#allocation3], 4294967168 }
 0x379   :  { %520 = vsyncpa [#allocation3], 1 }
 0x37a   :  { %521 = vsyncpa [#allocation4], 1 }

</bundles_post_ra>
